<compile_context>
chip_gen: v5e
topology: v5e:2x2
jax: 0.10.0
libtpu: 0.0.40
codegen_flags: <defaults>
</compile_context>

<pallas_src>
import functools

import jax
import jax.numpy as jnp
from jax import lax
from jax.experimental import pallas as pl
from jax.experimental.pallas import tpu as pltpu

_HIDDEN = 64
_OUT = 4
_OUT_PAD = 8     # sublane-aligned output rows inside the kernel


def _leaky_relu(x, slope=0.2):
    # Valid for 0 <= slope <= 1: max(x, slope*x) == leaky_relu(x, slope).
    return jnp.maximum(x, slope * x)


def _round_up(v, m):
    return ((v + m - 1) // m) * m


def toy_decoder_kernel(w1_ref, b1_ref, w2_ref, b2_ref, w3_ref, b3_ref,
                       x_ref, o_ref):
    """One batch tile of the 3-layer MLP; activations are batch-on-lane.

    w1_ref: (64, n_z)  layer-1 weight, PyTorch (out, in) layout
    w2_ref: (64, 64)   layer-2 weight
    w3_ref: (8, 64)    layer-3 weight, zero padded from (4, 64)
    b*_ref: (64|8, 1)  biases (f32)
    x_ref : (TB, n_z)  input tile, row-major exactly as it lives in HBM
    o_ref : (8, TB)    output tile (lane-dense, 8-sublane aligned)
    """
    cdt = x_ref.dtype
    x = x_ref[...]                                        # (TB, n_z)

    # Layer 1: contract the feature axes of W1 (64, n_z) and x (TB, n_z)
    # directly -> (64, TB); the implied x transpose stays on-chip.
    h = lax.dot_general(w1_ref[...], x,
                        dimension_numbers=(((1,), (1,)), ((), ())),
                        preferred_element_type=jnp.float32)
    h = _leaky_relu(h + b1_ref[...])                      # (64, TB) f32

    # Layer 2.
    h = jnp.dot(w2_ref[...], h.astype(cdt),
                preferred_element_type=jnp.float32)
    h = _leaky_relu(h + b2_ref[...])                      # (64, TB) f32

    # Layer 3 (8 padded output rows; rows 4:8 are zeros, sliced off outside).
    h = jnp.dot(w3_ref[...], h.astype(cdt),
                preferred_element_type=jnp.float32)
    h = _leaky_relu(h + b3_ref[...])                      # (8, TB) f32

    o_ref[...] = h.astype(o_ref.dtype)


@functools.partial(jax.jit, static_argnames=("block_b", "compute_dtype"))
def toy_decoder_forward(x, params, *, block_b=8192, compute_dtype=jnp.bfloat16):
    """x: (B, n_z), params in PyTorch layout -> (B, 2, 2) float32."""
    B, n_z = x.shape
    w1, b1, w2, b2, w3, b3 = params
    cdt = jnp.dtype(compute_dtype)

    # Operands in compute dtype (bf16 by default); accumulation stays f32.
    w1c = w1.astype(cdt)                                  # (64, n_z)
    w2c = w2.astype(cdt)                                  # (64, 64)
    w3c = jnp.zeros((_OUT_PAD, _HIDDEN), cdt).at[:_OUT].set(w3.astype(cdt))
    b1c = b1.astype(jnp.float32).reshape(_HIDDEN, 1)
    b2c = b2.astype(jnp.float32).reshape(_HIDDEN, 1)
    b3c = jnp.zeros((_OUT_PAD, 1), jnp.float32).at[:_OUT, 0].set(
        b3.astype(jnp.float32))

    xk = x.astype(cdt)                                    # (B, n_z) row-major

    # Lane-dense batch tile (multiple of 128), capped at block_b, and sized so
    # large batches get >= 2 grid steps (v7x megacore sharding).
    b128 = _round_up(B, 128)
    tb = min(block_b, _round_up(pl.cdiv(b128, 2), 128))
    b_pad = _round_up(B, tb)
    if b_pad != B:
        # Zero-pad the tail tile. Padded rows only see bias + LeakyReLU and
        # are sliced off below (the kernel never reduces over the batch axis).
        xk = jnp.pad(xk, ((0, b_pad - B), (0, 0)))

    grid = (b_pad // tb,)

    out = pl.pallas_call(
        toy_decoder_kernel,
        out_shape=jax.ShapeDtypeStruct((_OUT_PAD, b_pad), jnp.float32),
        grid_spec=pltpu.PrefetchScalarGridSpec(
            num_scalar_prefetch=0,
            grid=grid,
            in_specs=[
                # Params: constant index_map -> DMA'd once, VMEM-resident.
                pl.BlockSpec((_HIDDEN, n_z), lambda i: (0, 0)),
                pl.BlockSpec((_HIDDEN, 1), lambda i: (0, 0)),
                pl.BlockSpec((_HIDDEN, _HIDDEN), lambda i: (0, 0)),
                pl.BlockSpec((_HIDDEN, 1), lambda i: (0, 0)),
                pl.BlockSpec((_OUT_PAD, _HIDDEN), lambda i: (0, 0)),
                pl.BlockSpec((_OUT_PAD, 1), lambda i: (0, 0)),
                # Input: batch tiled along the leading (HBM-contiguous) axis,
                # no wrapper-side transpose.
                pl.BlockSpec((tb, n_z), lambda i: (i, 0)),
            ],
            out_specs=pl.BlockSpec((_OUT_PAD, tb), lambda i: (0, i)),
        ),
        compiler_params=pltpu.CompilerParams(
            dimension_semantics=("parallel",),   # shard tiles across v7x's 2 TCs
            vmem_limit_bytes=48 * 1024 * 1024,   # headroom for TB up to ~16K
        ),
    )(w1c, b1c, w2c, b2c, w3c, b3c, xk)

    # TODO(synk): if the consumer accepts (4, B) (or bf16) output, skip this
    # tiny trailing relayout; kept to honour the module's (B, 2, 2) contract.
    return out[:_OUT, :B].T.reshape(B, 2, 2)


def init_params(key, n_z):
    """PyTorch-layout params: W (out_features, in_features), b (out_features,)."""
    ks = jax.random.split(key, 6)

    def linear(kw, kb, fan_in, fan_out):
        bound = 1.0 / jnp.sqrt(jnp.float32(fan_in))
        w = jax.random.uniform(kw, (fan_out, fan_in), jnp.float32, -bound, bound)
        b = jax.random.uniform(kb, (fan_out,), jnp.float32, -bound, bound)
        return w, b

    w1, b1 = linear(ks[0], ks[1], n_z, _HIDDEN)
    w2, b2 = linear(ks[2], ks[3], _HIDDEN, _HIDDEN)
    w3, b3 = linear(ks[4], ks[5], _HIDDEN, _OUT)
    return (w1, b1, w2, b2, w3, b3)


def reference_forward(x, params):
    """Pure-JAX reference of the PyTorch forward, for correctness checking."""
    w1, b1, w2, b2, w3, b3 = params

    def leaky(v):
        return jnp.where(v > 0, v, 0.2 * v)

    h = leaky(x @ w1.T + b1)
    h = leaky(h @ w2.T + b2)
    h = leaky(h @ w3.T + b3)
    return h.reshape(x.shape[0], 2, 2)


if __name__ == "__main__":
    key = jax.random.PRNGKey(0)
    k_x, k_p = jax.random.split(key)

    n_z = 8
    batch = 8
    x = jax.random.normal(k_x, (batch, n_z), jnp.float32)
    params = init_params(k_p, n_z)
    ref = reference_forward(x, params)

    # f32 operands: bit-tight check of the kernel structure.
    out_f32 = jax.block_until_ready(
        toy_decoder_forward(x, params, compute_dtype=jnp.float32))
    assert out_f32.shape == (batch, 2, 2), out_f32.shape
    assert jnp.allclose(out_f32, ref, atol=1e-4, rtol=1e-4), "f32 mismatch"

    # Default bf16 operands (f32 accumulation): looser tolerance.
    out_bf16 = jax.block_until_ready(toy_decoder_forward(x, params))
    assert out_bf16.shape == (batch, 2, 2), out_bf16.shape
    assert jnp.allclose(out_bf16, ref, atol=5e-2, rtol=5e-2), "bf16 mismatch"

    # Batch that is not a multiple of the tile: multi-tile grid + padded tail.
    batch2 = 300
    x2 = jax.random.normal(k_x, (batch2, n_z), jnp.float32)
    ref2 = reference_forward(x2, params)
    out2 = jax.block_until_ready(
        toy_decoder_forward(x2, params, block_b=128, compute_dtype=jnp.float32))
    assert out2.shape == (batch2, 2, 2), out2.shape
    assert jnp.allclose(out2, ref2, atol=1e-4, rtol=1e-4), "tail-path mismatch"

    print("KERNEL_OK")
</pallas_src>

<mosaic_0001>
module attributes {stable_mosaic.version = 11 : i64} {
  func.func @toy_decoder_kernel(%arg0: i32, %arg1: memref<64x8xf32, #tpu.memory_space<vmem>>, %arg2: memref<64x1xf32, #tpu.memory_space<vmem>>, %arg3: memref<64x64xf32, #tpu.memory_space<vmem>>, %arg4: memref<64x1xf32, #tpu.memory_space<vmem>>, %arg5: memref<8x64xf32, #tpu.memory_space<vmem>>, %arg6: memref<8x1xf32, #tpu.memory_space<vmem>>, %arg7: memref<128x8xf32, #tpu.memory_space<vmem>>, %arg8: memref<8x128xf32, #tpu.memory_space<vmem>>) attributes {dimension_semantics = [#tpu.dimension_semantics<parallel>], iteration_bounds = array<i64: 1>, scalar_prefetch = 0 : i64, scratch_operands = 0 : i64, tpu.core_type = #tpu.core_type<tc>, window_params = [{pipeline_mode = #tpu.pipeline_mode<synchronous>, transform_indices = @transform_0, window_bounds = array<i64: 64, 8>}, {pipeline_mode = #tpu.pipeline_mode<synchronous>, transform_indices = @transform_1, window_bounds = array<i64: 64, 1>}, {pipeline_mode = #tpu.pipeline_mode<synchronous>, transform_indices = @transform_2, window_bounds = array<i64: 64, 64>}, {pipeline_mode = #tpu.pipeline_mode<synchronous>, transform_indices = @transform_3, window_bounds = array<i64: 64, 1>}, {pipeline_mode = #tpu.pipeline_mode<synchronous>, transform_indices = @transform_4, window_bounds = array<i64: 8, 64>}, {pipeline_mode = #tpu.pipeline_mode<synchronous>, transform_indices = @transform_5, window_bounds = array<i64: 8, 1>}, {transform_indices = @transform_6, window_bounds = array<i64: 128, 8>}, {transform_indices = @transform_7, window_bounds = array<i64: 8, 128>}]} {
    %c0 = arith.constant 0 : index
    %c0_0 = arith.constant 0 : index
    %0 = vector.load %arg7[%c0, %c0_0] : memref<128x8xf32, #tpu.memory_space<vmem>>, vector<128x8xf32>
    %c0_1 = arith.constant 0 : index
    %c0_2 = arith.constant 0 : index
    %1 = vector.load %arg1[%c0_1, %c0_2] : memref<64x8xf32, #tpu.memory_space<vmem>>, vector<64x8xf32>
    %cst = arith.constant dense<0.000000e+00> : vector<64x128xf32>
    %2 = tpu.matmul %1, %0, %cst {dimension_numbers = #tpu.dot_dimension_numbers<[1], [1], [0], [0], [0, 0, 1, 0], [], []>} : vector<64x8xf32>, vector<128x8xf32>, vector<64x128xf32> -> vector<64x128xf32>
    %c0_3 = arith.constant 0 : index
    %c0_4 = arith.constant 0 : index
    %3 = vector.load %arg2[%c0_3, %c0_4] : memref<64x1xf32, #tpu.memory_space<vmem>>, vector<64x1xf32>
    %4 = vector.broadcast %3 : vector<64x1xf32> to vector<64x128xf32>
    %5 = arith.addf %2, %4 : vector<64x128xf32>
    %cst_5 = arith.constant 2.000000e-01 : f32
    %6 = vector.broadcast %cst_5 : f32 to vector<64x128xf32>
    %7 = arith.mulf %6, %5 : vector<64x128xf32>
    %8 = arith.maximumf %5, %7 : vector<64x128xf32>
    %c0_6 = arith.constant 0 : index
    %c0_7 = arith.constant 0 : index
    %9 = vector.load %arg3[%c0_6, %c0_7] : memref<64x64xf32, #tpu.memory_space<vmem>>, vector<64x64xf32>
    %cst_8 = arith.constant dense<0.000000e+00> : vector<64x128xf32>
    %10 = tpu.matmul %9, %8, %cst_8 {dimension_numbers = #tpu.dot_dimension_numbers<[1], [0], [0], [1], [0, 0, 1, 1], [], []>} : vector<64x64xf32>, vector<64x128xf32>, vector<64x128xf32> -> vector<64x128xf32>
    %c0_9 = arith.constant 0 : index
    %c0_10 = arith.constant 0 : index
    %11 = vector.load %arg4[%c0_9, %c0_10] : memref<64x1xf32, #tpu.memory_space<vmem>>, vector<64x1xf32>
    %12 = vector.broadcast %11 : vector<64x1xf32> to vector<64x128xf32>
    %13 = arith.addf %10, %12 : vector<64x128xf32>
    %cst_11 = arith.constant 2.000000e-01 : f32
    %14 = vector.broadcast %cst_11 : f32 to vector<64x128xf32>
    %15 = arith.mulf %14, %13 : vector<64x128xf32>
    %16 = arith.maximumf %13, %15 : vector<64x128xf32>
    %c0_12 = arith.constant 0 : index
    %c0_13 = arith.constant 0 : index
    %17 = vector.load %arg5[%c0_12, %c0_13] : memref<8x64xf32, #tpu.memory_space<vmem>>, vector<8x64xf32>
    %cst_14 = arith.constant dense<0.000000e+00> : vector<8x128xf32>
    %18 = tpu.matmul %17, %16, %cst_14 {dimension_numbers = #tpu.dot_dimension_numbers<[1], [0], [0], [1], [0, 0, 1, 1], [], []>} : vector<8x64xf32>, vector<64x128xf32>, vector<8x128xf32> -> vector<8x128xf32>
    %c0_15 = arith.constant 0 : index
    %c0_16 = arith.constant 0 : index
    %19 = vector.load %arg6[%c0_15, %c0_16] : memref<8x1xf32, #tpu.memory_space<vmem>>, vector<8x1xf32>
    %20 = vector.broadcast %19 : vector<8x1xf32> to vector<8x128xf32>
    %21 = arith.addf %18, %20 : vector<8x128xf32>
    %cst_17 = arith.constant 2.000000e-01 : f32
    %22 = vector.broadcast %cst_17 : f32 to vector<8x128xf32>
    %23 = arith.mulf %22, %21 : vector<8x128xf32>
    %24 = arith.maximumf %21, %23 : vector<8x128xf32>
    %c0_18 = arith.constant 0 : index
    %c0_19 = arith.constant 0 : index
    %25 = vector.load %arg8[%c0_18, %c0_19] : memref<8x128xf32, #tpu.memory_space<vmem>>, vector<8x128xf32>
    tpu.vector_store %arg8[%c0_18, %c0_19], %24 {strides = array<i32>} : memref<8x128xf32, #tpu.memory_space<vmem>>, vector<8x128xf32>,
    return
  }
  func.func @transform_0(%arg0: i32) -> (i32, i32) {
    %c0_i32 = arith.constant 0 : i32
    %c0_i32_0 = arith.constant 0 : i32
    %c0_i32_1 = arith.constant 0 : i32
    return %c0_i32, %c0_i32_0 : i32, i32
  }
  func.func @transform_1(%arg0: i32) -> (i32, i32) {
    %c0_i32 = arith.constant 0 : i32
    %c0_i32_0 = arith.constant 0 : i32
    %c0_i32_1 = arith.constant 0 : i32
    return %c0_i32, %c0_i32_0 : i32, i32
  }
  func.func @transform_2(%arg0: i32) -> (i32, i32) {
    %c0_i32 = arith.constant 0 : i32
    %c0_i32_0 = arith.constant 0 : i32
    %c0_i32_1 = arith.constant 0 : i32
    return %c0_i32, %c0_i32_0 : i32, i32
  }
  func.func @transform_3(%arg0: i32) -> (i32, i32) {
    %c0_i32 = arith.constant 0 : i32
    %c0_i32_0 = arith.constant 0 : i32
    %c0_i32_1 = arith.constant 0 : i32
    return %c0_i32, %c0_i32_0 : i32, i32
  }
  func.func @transform_4(%arg0: i32) -> (i32, i32) {
    %c0_i32 = arith.constant 0 : i32
    %c0_i32_0 = arith.constant 0 : i32
    %c0_i32_1 = arith.constant 0 : i32
    return %c0_i32, %c0_i32_0 : i32, i32
  }
  func.func @transform_5(%arg0: i32) -> (i32, i32) {
    %c0_i32 = arith.constant 0 : i32
    %c0_i32_0 = arith.constant 0 : i32
    %c0_i32_1 = arith.constant 0 : i32
    return %c0_i32, %c0_i32_0 : i32, i32
  }
  func.func @transform_6(%arg0: i32) -> (i32, i32) {
    %c0_i32 = arith.constant 0 : i32
    %c0_i32_0 = arith.constant 0 : i32
    return %arg0, %c0_i32 : i32, i32
  }
  func.func @transform_7(%arg0: i32) -> (i32, i32) {
    %c0_i32 = arith.constant 0 : i32
    %c0_i32_0 = arith.constant 0 : i32
    return %c0_i32, %arg0 : i32, i32
  }
}

</mosaic_0001>

<bundles_post_ra>
// kernel: toy_decoder_forward.1
= control target key start
LH: loop header
LB: loop body
LE: loop exit
PB: predicated region body
PF: predicated region fallthrough
CT: control target
= control target key end

     0   :  { %vm98_vm0 = vcmask 64512   ;;  %v472_v7 = vmov 0   ;;  %vm284_vm1 = vcmask 523264   ;;  %s731_s6 = inlined_call_operand.vmem [shape: f32[128,8], index: 6, kind: input, shape index: {}]   ;;  %s732_s1 = inlined_call_operand.vmem [shape: f32[64,1], index: 1, kind: input, shape index: {}]   ;;  %s733_s3 = inlined_call_operand.vmem [shape: f32[64,1], index: 3, kind: input, shape index: {}]   ;;  %s734_s5 = inlined_call_operand.vmem [shape: f32[8,1], index: 5, kind: input, shape index: {}]   ;;  %s735_s0 = inlined_call_operand.vmem [shape: f32[64,8], index: 0, kind: input, shape index: {}]   ;;  %s736_s2 = inlined_call_operand.vmem [shape: f32[64,64], index: 2, kind: input, shape index: {}]   ;;  %s737_s4 = inlined_call_operand.vmem [shape: f32[8,64], index: 4, kind: input, shape index: {}]   ;;  %s738_s7 = inlined_call_operand.vmem [shape: f32[8,128], index: 7, kind: output, shape index: {}]  }
   0x1   :  { %v41_v0 = vld [vmem:[%s731_s6 + $0x78] sm:$0xff]  ;;  %v40_v1 = vld [vmem:[%s731_s6 + $0x70] sm:$0xff]  ;;  %v39_v2 = vld [vmem:[%s731_s6 + $0x68] sm:$0xff]  ;;  %469 = vset.pattern.permute.xlu0 %v472_v7  ;;  %470 = vset.pattern.permute.xlu1 %v472_v7 }
   0x2   :  { %437 = vmatpush.xpose.msk.msra.mxu3 %vm98_vm0, %v41_v0  ;;  %436 = vmatpush.xpose.msk.msra.mxu2 %vm98_vm0, %v41_v0  ;;  %v38_v3 = vld [vmem:[%s731_s6 + $0x60] sm:$0xff]  ;;  %v37_v4 = vld [vmem:[%s731_s6 + $0x58] sm:$0xff]  ;;  %v36_v6 = vld [vmem:[%s731_s6 + $0x50] sm:$0xff] }
   0x3   :  { %403 = vmatpush.xpose.msk.msra.mxu0 %vm98_vm0, %v41_v0  ;;  %v57_v5 = vld [vmem:[%s732_s1 + $0x38] sm:$0xff]  ;;  %471 = vset.pattern.permute.xlu2 %v472_v7  ;;  %v55_v8 = vld [vmem:[%s732_s1 + $0x28] sm:$0xff]  ;;  %v56_v10 = vld [vmem:[%s732_s1 + $0x30] sm:$0xff] }
   0x4   :  { %95 = vperm.xlu0 %469, %v57_v5   ;;  %v35_v9 = vld [vmem:[%s731_s6 + $0x48] sm:$0xff]  ;;  %85 = vperm.xlu1 %470, %v55_v8   ;;  %v34_v11 = vld [vmem:[%s731_s6 + $0x40] sm:$0xff]  ;;  %v33_v13 = vld [vmem:[%s731_s6 + $0x38] sm:$0xff] }
   0x5   :  { %v54_v12 = vld [vmem:[%s732_s1 + $0x20] sm:$0xff]  ;;  %v51_v14 = vld [vmem:[%s732_s1 + $0x8] sm:$0xff]  ;;  %v32_v15 = vld [vmem:[%s731_s6 + $0x30] sm:$0xff] }
   0x6   :  { %439 = vmatpush.xpose.msk.msra.mxu3 %vm98_vm0, %v40_v1  ;;  %438 = vmatpush.xpose.msk.msra.mxu2 %vm98_vm0, %v40_v1  ;;  %v50_v16 = vld [vmem:[%s732_s1] sm:$0xff]  ;;  %v31_v17 = vld [vmem:[%s731_s6 + $0x28] sm:$0xff]  ;;  %v242_v18 = vld [vmem:[%s733_s3 + $0x30] sm:$0xff] }
   0x7   :  { %404 = vmatpush.xpose.msk.msra.mxu0 %vm98_vm0, %v40_v1  ;;  %v30_v19 = vld [vmem:[%s731_s6 + $0x20] sm:$0xff]  ;;  %v241_v20 = vld [vmem:[%s733_s3 + $0x28] sm:$0xff]  ;;  %v29_v21 = vld [vmem:[%s731_s6 + $0x18] sm:$0xff] }
   0x8   :  { %v239_v22 = vld [vmem:[%s733_s3 + $0x18] sm:$0xff]  ;;  %v28_v24 = vld [vmem:[%s731_s6 + $0x10] sm:$0xff]  ;;  %v27_v26 = vld [vmem:[%s731_s6 + $0x8] sm:$0xff] }
   0x9   :  { %v53_v23 = vld [vmem:[%s732_s1 + $0x18] sm:$0xff]  ;;  %v238_v25 = vld [vmem:[%s733_s3 + $0x10] sm:$0xff]  ;;  %v236_v28 = vld [vmem:[%s733_s3] sm:$0xff] }
   0xa   :  { %441 = vmatpush.xpose.msk.msra.mxu3 %vm98_vm0, %v39_v2  ;;  %440 = vmatpush.xpose.msk.msra.mxu2 %vm98_vm0, %v39_v2  ;;  %v52_v27 = vld [vmem:[%s732_s1 + $0x10] sm:$0xff]  ;;  %v26_v29 = vld [vmem:[%s731_s6] sm:$0xff]  ;;  %v47_v31 = vld [vmem:[%s735_s0 + $0x28] sm:$0xff] }
   0xb   :  { %405 = vmatpush.xpose.msk.msra.mxu0 %vm98_vm0, %v39_v2  ;;  %75 = vperm.xlu2 %471, %v53_v23   ;;  %v367_v30 = vld [vmem:[%s734_s5] sm:$0xff]  ;;  %v45_v32 = vld [vmem:[%s735_s0 + $0x18] sm:$0xff]  ;;  %v48_v35 = vld [vmem:[%s735_s0 + $0x30] sm:$0xff] }
   0xc   :  { %90 = vperm.xlu0 %469, %v56_v10   ;;  %80 = vperm.xlu1 %470, %v54_v12   ;;  %v42_v33 = vld [vmem:[%s735_s0] sm:$0xff]  ;;  %v243_v34 = vld [vmem:[%s733_s3 + $0x38] sm:$0xff]  ;;  %v43_v37 = vld [vmem:[%s735_s0 + $0x8] sm:$0xff] }
   0xd   :  { %v46_v36 = vld [vmem:[%s735_s0 + $0x20] sm:$0xff]  ;;  %v49_v39 = vld [vmem:[%s735_s0 + $0x38] sm:$0xff]  ;;  %v44_v40 = vld [vmem:[%s735_s0 + $0x10] sm:$0xff] }
   0xe   :  { %443 = vmatpush.xpose.msk.msra.mxu3 %vm98_vm0, %v38_v3  ;;  %442 = vmatpush.xpose.msk.msra.mxu2 %vm98_vm0, %v38_v3  ;;  %v240_v38 = vld [vmem:[%s733_s3 + $0x20] sm:$0xff]  ;;  %v237_v41 = vld [vmem:[%s733_s3 + $0x8] sm:$0xff] }
   0xf   :  { %406 = vmatpush.xpose.msk.msra.mxu0 %vm98_vm0, %v38_v3  ;;  %v233_v23 = vld [vmem:[%s736_s2 + $0x28] sm:$0xff] }
  0x12   :  { %445 = vmatpush.xpose.msk.msra.mxu3 %vm98_vm0, %v37_v4  ;;  %444 = vmatpush.xpose.msk.msra.mxu2 %vm98_vm0, %v37_v4 }
  0x13   :  { %407 = vmatpush.xpose.msk.msra.mxu0 %vm98_vm0, %v37_v4  ;;  %70 = vperm.xlu2 %471, %v52_v27  }
  0x14   :  { %65 = vperm.xlu0 %469, %v51_v14   ;;  %60 = vperm.xlu1 %470, %v50_v16  }
  0x16   :  { %447 = vmatpush.xpose.msk.msra.mxu3 %vm98_vm0, %v36_v6  ;;  %446 = vmatpush.xpose.msk.msra.mxu2 %vm98_vm0, %v36_v6 }
  0x17   :  { %408 = vmatpush.xpose.msk.msra.mxu0 %vm98_vm0, %v36_v6 }
  0x1a   :  { %449 = vmatpush.xpose.msk.msra.mxu3 %vm98_vm0, %v35_v9  ;;  %448 = vmatpush.xpose.msk.msra.mxu2 %vm98_vm0, %v35_v9 }
  0x1b   :  { %409 = vmatpush.xpose.msk.msra.mxu0 %vm98_vm0, %v35_v9  ;;  %281 = vperm.xlu2 %471, %v243_v34  }
  0x1c   :  { %276 = vperm.xlu0 %469, %v242_v18   ;;  %271 = vperm.xlu1 %470, %v241_v20   ;;  %v228_v18 = vld [vmem:[%s736_s2] sm:$0xff]  ;;  %v230_v20 = vld [vmem:[%s736_s2 + $0x10] sm:$0xff] }
  0x1e   :  { %451 = vmatpush.xpose.msk.msra.mxu3 %vm98_vm0, %v34_v11  ;;  %450 = vmatpush.xpose.msk.msra.mxu2 %vm98_vm0, %v34_v11 }
  0x1f   :  { %410 = vmatpush.xpose.msk.msra.mxu0 %vm98_vm0, %v34_v11 }
  0x22   :  { %453 = vmatpush.xpose.msk.msra.mxu3 %vm98_vm0, %v33_v13  ;;  %452 = vmatpush.xpose.msk.msra.mxu2 %vm98_vm0, %v33_v13 }
  0x23   :  { %411 = vmatpush.xpose.msk.msra.mxu0 %vm98_vm0, %v33_v13  ;;  %266 = vperm.xlu2 %471, %v240_v38  }
  0x24   :  { %261 = vperm.xlu0 %469, %v239_v22   ;;  %256 = vperm.xlu1 %470, %v238_v25   ;;  %v232_v22 = vld [vmem:[%s736_s2 + $0x20] sm:$0xff]  ;;  %v235_v25 = vld [vmem:[%s736_s2 + $0x38] sm:$0xff] }
  0x26   :  { %455 = vmatpush.xpose.msk.msra.mxu3 %vm98_vm0, %v32_v15  ;;  %454 = vmatpush.xpose.msk.msra.mxu2 %vm98_vm0, %v32_v15 }
  0x27   :  { %412 = vmatpush.xpose.msk.msra.mxu0 %vm98_vm0, %v32_v15 }
  0x2a   :  { %457 = vmatpush.xpose.msk.msra.mxu3 %vm98_vm0, %v31_v17  ;;  %456 = vmatpush.xpose.msk.msra.mxu2 %vm98_vm0, %v31_v17 }
  0x2b   :  { %413 = vmatpush.xpose.msk.msra.mxu0 %vm98_vm0, %v31_v17  ;;  %251 = vperm.xlu2 %471, %v237_v41  }
  0x2c   :  { %246 = vperm.xlu0 %469, %v236_v28   ;;  %370 = vperm.xlu1 %470, %v367_v30  }
  0x2e   :  { %459 = vmatpush.xpose.msk.msra.mxu3 %vm98_vm0, %v30_v19  ;;  %458 = vmatpush.xpose.msk.msra.mxu2 %vm98_vm0, %v30_v19 }
  0x2f   :  { %414 = vmatpush.xpose.msk.msra.mxu0 %vm98_vm0, %v30_v19  ;;  %v229_v19 = vld [vmem:[%s736_s2 + $0x8] sm:$0xff] }
  0x32   :  { %461 = vmatpush.xpose.msk.msra.mxu3 %vm98_vm0, %v29_v21  ;;  %460 = vmatpush.xpose.msk.msra.mxu2 %vm98_vm0, %v29_v21 }
  0x33   :  { %415 = vmatpush.xpose.msk.msra.mxu0 %vm98_vm0, %v29_v21  ;;  %v231_v21 = vld [vmem:[%s736_s2 + $0x18] sm:$0xff] }
  0x36   :  { %463 = vmatpush.xpose.msk.msra.mxu3 %vm98_vm0, %v28_v24  ;;  %462 = vmatpush.xpose.msk.msra.mxu2 %vm98_vm0, %v28_v24 }
  0x37   :  { %416 = vmatpush.xpose.msk.msra.mxu0 %vm98_vm0, %v28_v24  ;;  %v234_v24 = vld [vmem:[%s736_s2 + $0x30] sm:$0xff] }
  0x3a   :  { %465 = vmatpush.xpose.msk.msra.mxu3 %vm98_vm0, %v27_v26  ;;  %464 = vmatpush.xpose.msk.msra.mxu2 %vm98_vm0, %v27_v26 }
  0x3b   :  { %417 = vmatpush.xpose.msk.msra.mxu0 %vm98_vm0, %v27_v26 }
  0x3e   :  { %467 = vmatpush.xpose.msk.msra.mxu3 %vm98_vm0, %v26_v29  ;;  %466 = vmatpush.xpose.msk.msra.mxu2 %vm98_vm0, %v26_v29 }
  0x3f   :  { %418 = vmatpush.xpose.msk.msra.mxu0 %vm98_vm0, %v26_v29 }
  0x41   :  { %424 = vmatmul.msk.f32.vlgmr.msra.gmra.mxu3 %vm98_vm0, %v47_v31  ;;  %422 = vmatmul.msk.f32.vlgmr.msra.gmra.mxu2 %vm98_vm0, %v45_v32 }
  0x42   :  { %419 = vmatmul.msk.f32.vlgmr.msra.gmra.mxu0 %vm98_vm0, %v42_v33 }
  0x49   :  { %425 = vmatmul.msk.f32.gmra.mxu3 %vm98_vm0, %v48_v35  ;;  %423 = vmatmul.msk.f32.gmra.mxu2 %vm98_vm0, %v46_v36 }
  0x4a   :  { %420 = vmatmul.msk.f32.gmra.mxu0 %vm98_vm0, %v43_v37 }
  0x51   :  { %426 = vmatmul.msk.f32.gmra.mxu3 %vm98_vm0, %v49_v39 }
  0x52   :  { %421 = vmatmul.msk.f32.gmra.mxu0 %vm98_vm0, %v44_v40 }
  0x65   :  { %v76_v49 = vpop.permute.xlu2 %75 }
  0x6d   :  { %v71_v0 = vpop.permute.xlu2 %70 }
  0x75   :  { %v282_v32 = vpop.permute.xlu2 %281 }
  0x76   :  { %v96_v44 = vpop.permute.xlu0 %95  ;;  %v86_v45 = vpop.permute.xlu1 %85 }
  0x7d   :  { %v267_v36 = vpop.permute.xlu2 %266 }
  0x7e   :  { %v91_v50 = vpop.permute.xlu0 %90  ;;  %v81_v51 = vpop.permute.xlu1 %80 }
  0x86   :  { %v66_v4 = vpop.permute.xlu0 %65  ;;  %v61_v8 = vpop.permute.xlu1 %60 }
  0x8e   :  { %v277_v33 = vpop.permute.xlu0 %276  ;;  %v272_v35 = vpop.permute.xlu1 %271 }
  0x96   :  { %v262_v38 = vpop.permute.xlu0 %261 }
  0xbf   :  { %v188_v42 = vpop.f32.mrf.mxu0 }
  0xc0   :  { %v189_v9 = vadd.f32 %v188_v42, %v61_v8 }
  0xc2   :  { %v212_v14 = vmul.f32 0.2, %v189_v9 }
  0xc4   :  { %v203_v43 = vpop.f32.mrf.mxu3  ;;  %v197_v46 = vpop.f32.mrf.mxu2  ;;  %v220_v17 = vmax.f32 %v189_v9, %v212_v14 }
  0xc5   :  { %v204_v55 = vadd.f32 %v203_v43, %v86_v45  ;;  %v198_v62 = vadd.f32 %v197_v46, %v76_v49 }
  0xc7   :  { %v191_v48 = vpop.f32.mrf.mxu0  ;;  %v217_v61 = vmul.f32 0.2, %v204_v55  ;;  %v215_v5 = vmul.f32 0.2, %v198_v62 }
  0xc8   :  { %v192_v6 = vadd.f32 %v191_v48, %v66_v4  ;;  %v257_v48 = vpop.permute.xlu1 %256 }
  0xc9   :  { %v225_v7 = vmax.f32 %v204_v55, %v217_v61  ;;  %v223_v13 = vmax.f32 %v198_v62, %v215_v5 }
  0xca   :  { %v213_v12 = vmul.f32 0.2, %v192_v6 }
  0xcc   :  { %v206_v47 = vpop.f32.mrf.mxu3  ;;  %v200_v53 = vpop.f32.mrf.mxu2  ;;  %v221_v16 = vmax.f32 %v192_v6, %v213_v12 }
  0xcd   :  { %v207_v52 = vadd.f32 %v206_v47, %v91_v50  ;;  %v201_v58 = vadd.f32 %v200_v53, %v81_v51 }
  0xcf   :  { %v218_v57 = vmul.f32 0.2, %v207_v52  ;;  %v194_v60 = vpop.f32.mrf.mxu0  ;;  %v216_v1 = vmul.f32 0.2, %v201_v58 }
  0xd0   :  { %v195_v2 = vadd.f32 %v194_v60, %v71_v0 }
  0xd1   :  { %v226_v3 = vmax.f32 %v207_v52, %v218_v57  ;;  %v224_v11 = vmax.f32 %v201_v58, %v216_v1  ;;  %v252_v52 = vpop.permute.xlu2 %251 }
  0xd2   :  { %v214_v10 = vmul.f32 0.2, %v195_v2 }
  0xd4   :  { %v209_v54 = vpop.f32.mrf.mxu3  ;;  %v222_v15 = vmax.f32 %v195_v2, %v214_v10  ;;  %v366_v2 = vld [vmem:[%s737_s4] sm:$0xff] }
  0xd5   :  { %v210_v56 = vadd.f32 %v209_v54, %v96_v44 }
  0xd7   :  { %v219_v59 = vmul.f32 0.2, %v210_v56 }
  0xd9   :  { %v227_v63 = vmax.f32 %v210_v56, %v219_v59  ;;  %v247_v56 = vpop.permute.xlu0 %246 }
  0xdb   :  { %317 = vmatpush.msra.mxu1 %v227_v63 }
  0xdd   :  { %318 = vmatpush.msra.mxu1 %v226_v3  ;;  %v371_v3 = vpop.permute.xlu1 %370 }
  0xdf   :  { %319 = vmatpush.msra.mxu1 %v225_v7 }
  0xe1   :  { %320 = vmatpush.msra.mxu1 %v224_v11 }
  0xe3   :  { %321 = vmatpush.msra.mxu1 %v223_v13 }
  0xe5   :  { %322 = vmatpush.msra.mxu1 %v222_v15 }
  0xe7   :  { %323 = vmatpush.msra.mxu1 %v221_v16 }
  0xe9   :  { %324 = vmatpush.msra.mxu1 %v220_v17 }
  0xea   :  { %427 = vmatmul.msk.f32.vlgmr.msra.gmra.mxu1 %vm284_vm1, %v228_v18 }
  0xf2   :  { %428 = vmatmul.msk.f32.gmra.mxu1 %vm284_vm1, %v229_v19 }
  0xfa   :  { %429 = vmatmul.msk.f32.gmra.mxu1 %vm284_vm1, %v230_v20 }
 0x102   :  { %430 = vmatmul.msk.f32.gmra.mxu1 %vm284_vm1, %v231_v21 }
 0x10a   :  { %431 = vmatmul.msk.f32.gmra.mxu1 %vm284_vm1, %v232_v22 }
 0x112   :  { %432 = vmatmul.msk.f32.gmra.mxu1 %vm284_vm1, %v233_v23 }
 0x11a   :  { %433 = vmatmul.msk.f32.gmra.mxu1 %vm284_vm1, %v234_v24 }
 0x122   :  { %434 = vmatmul.msk.f32.gmra.mxu1 %vm284_vm1, %v235_v25 }
 0x167   :  { %v326_v26 = vpop.f32.mrf.mxu1 }
 0x168   :  { %v327_v57 = vadd.f32 %v326_v26, %v247_v56 }
 0x16a   :  { %v350_v62 = vmul.f32 0.2, %v327_v57 }
 0x16c   :  { %v358_v1 = vmax.f32 %v327_v57, %v350_v62 }
 0x16f   :  { %v329_v27 = vpop.f32.mrf.mxu1 }
 0x170   :  { %v330_v53 = vadd.f32 %v329_v27, %v252_v52 }
 0x172   :  { %v351_v60 = vmul.f32 0.2, %v330_v53 }
 0x174   :  { %v359_v0 = vmax.f32 %v330_v53, %v351_v60 }
 0x177   :  { %v332_v28 = vpop.f32.mrf.mxu1 }
 0x178   :  { %v333_v49 = vadd.f32 %v332_v28, %v257_v48 }
 0x17a   :  { %v352_v58 = vmul.f32 0.2, %v333_v49 }
 0x17c   :  { %v360_v63 = vmax.f32 %v333_v49, %v352_v58 }
 0x17f   :  { %v335_v29 = vpop.f32.mrf.mxu1 }
 0x180   :  { %v336_v45 = vadd.f32 %v335_v29, %v262_v38 }
 0x182   :  { %v353_v54 = vmul.f32 0.2, %v336_v45 }
 0x184   :  { %v361_v61 = vmax.f32 %v336_v45, %v353_v54 }
 0x187   :  { %v338_v30 = vpop.f32.mrf.mxu1 }
 0x188   :  { %v339_v42 = vadd.f32 %v338_v30, %v267_v36 }
 0x18a   :  { %v354_v50 = vmul.f32 0.2, %v339_v42 }
 0x18c   :  { %v362_v59 = vmax.f32 %v339_v42, %v354_v50 }
 0x18f   :  { %v341_v31 = vpop.f32.mrf.mxu1 }
 0x190   :  { %v342_v40 = vadd.f32 %v341_v31, %v272_v35 }
 0x192   :  { %v355_v46 = vmul.f32 0.2, %v342_v40 }
 0x194   :  { %v363_v55 = vmax.f32 %v342_v40, %v355_v46 }
 0x197   :  { %v344_v34 = vpop.f32.mrf.mxu1 }
 0x198   :  { %v345_v37 = vadd.f32 %v344_v34, %v277_v33 }
 0x19a   :  { %v356_v43 = vmul.f32 0.2, %v345_v37 }
 0x19c   :  { %v364_v51 = vmax.f32 %v345_v37, %v356_v43 }
 0x19f   :  { %v347_v39 = vpop.f32.mrf.mxu1 }
 0x1a0   :  { %v348_v41 = vadd.f32 %v347_v39, %v282_v32 }
 0x1a2   :  { %v357_v44 = vmul.f32 0.2, %v348_v41 }
 0x1a4   :  { %v365_v47 = vmax.f32 %v348_v41, %v357_v44 }
 0x1a6   :  { %384 = vmatpush.msrb.mxu2 %v365_v47 }
 0x1a8   :  { %385 = vmatpush.msrb.mxu2 %v364_v51 }
 0x1aa   :  { %386 = vmatpush.msrb.mxu2 %v363_v55 }
 0x1ac   :  { %387 = vmatpush.msrb.mxu2 %v362_v59 }
 0x1ae   :  { %388 = vmatpush.msrb.mxu2 %v361_v61 }
 0x1b0   :  { %389 = vmatpush.msrb.mxu2 %v360_v63 }
 0x1b2   :  { %390 = vmatpush.msrb.mxu2 %v359_v0 }
 0x1b4   :  { %391 = vmatpush.msrb.mxu2 %v358_v1 }
 0x1b5   :  { %435 = vmatmul.msk.f32.vlgmr.msrb.gmra.mxu2 %vm284_vm1, %v366_v2 }
 0x238   :  { %v393_v4 = vpop.f32.mrf.mxu2 }
 0x239   :  { %v394_v5 = vadd.f32 %v393_v4, %v371_v3 }
 0x23b   :  { %v396_v6 = vmul.f32 0.2, %v394_v5 }
 0x23d   :  { %v397_v7 = vmax.f32 %v394_v5, %v396_v6 }
 0x23f   :  { %398 = vst [vmem:[%s738_s7] sm:$0xff] %v397_v7 }

</bundles_post_ra>
